<compile_context>
chip_gen: v7x
topology: tpu7x:2x2x1
jax: 0.10.0
libtpu: 0.0.40
codegen_flags: <defaults>
</compile_context>

<pallas_src>
import jax
import jax.numpy as jnp
from jax.experimental import pallas as pl
from jax.experimental.pallas import tpu as pltpu


def _reduce_copy_kernel(x_ref, o_ref):
    # x_ref / o_ref: (B, TS, 128) tile in VMEM.  Accumulate in f32, scale by
    # 1/B, cast the (1, TS, 128) mean to the I/O dtype, then broadcast to all
    # B rows.
    b = x_ref.shape[0]
    x = x_ref[...].astype(jnp.float32)
    mean = jnp.sum(x, axis=0, keepdims=True) * (1.0 / b)          # (1, TS, 128)
    o_ref[...] = jnp.broadcast_to(mean.astype(o_ref.dtype), o_ref.shape)


def _round_up(v, m):
    return (v + m - 1) // m * m


def reduce_and_copy(x):
    """torch.mean(x, dim=0) broadcast back to all batch rows (same shape as x)."""
    orig_shape = x.shape
    b = orig_shape[0]
    x2 = x.reshape(b, -1)
    f = x2.shape[1]
    dtype_bytes = jnp.dtype(x.dtype).itemsize

    # --- lane packing ---------------------------------------------------------
    # Pad F only up to the next 128 lanes (never to grid_n * tile); for most
    # shapes (F % 128 == 0) this is a no-op and there is no post-kernel slice.
    f128 = _round_up(f, 128)
    if f128 != f:
        x2 = jnp.pad(x2, ((0, 0), (0, f128 - f)))
    nseg = f128 // 128
    x3 = x2.reshape(b, nseg, 128)          # metadata-only reshape (row-major)

    # --- per-generation block sizing ------------------------------------------
    try:
        vmem_cap = int(pltpu.get_tpu_info().vmem_capacity_bytes)
    except Exception:
        vmem_cap = 64 * 1024 * 1024        # conservative (v7x per-TC)
    if vmem_cap >= 100 * 1024 * 1024:      # v5e / v6e: 128 MiB VMEM
        target_block_bytes = 8 * 1024 * 1024
        vmem_budget = 96 * 1024 * 1024
    else:                                  # v7x: 64 MiB per TensorCore
        target_block_bytes = 4 * 1024 * 1024
        vmem_budget = 40 * 1024 * 1024

    # TS = segments (of 128 lanes) per block.  Multiple of 8 (sublane packing)
    # unless the whole feature extent fits in one block.
    seg_bytes = b * 128 * dtype_bytes
    ts_budget = max(8, (target_block_bytes // seg_bytes) // 8 * 8)
    if nseg <= ts_budget:
        ts = nseg                          # single full-extent block
    else:
        ts = ts_budget                     # ragged last block is masked by Pallas

    # If we already have multiple grid steps, prefer an even count so
    # dimension_semantics=("parallel",) splits evenly across v7x's two
    # TensorCores (no extra padding, just a rebalanced tile).
    grid_n = pl.cdiv(nseg, ts)
    if grid_n > 1 and grid_n % 2 == 1:
        ts_even = max(8, _round_up(pl.cdiv(nseg, grid_n + 1), 8))
        if pl.cdiv(nseg, ts_even) % 2 == 0:
            ts = ts_even
            grid_n = pl.cdiv(nseg, ts)

    # --- VMEM limit -----------------------------------------------------------
    # Double-buffered input + double-buffered output + headroom.
    block_bytes = b * ts * 128 * dtype_bytes
    vmem_limit = max(16 * 1024 * 1024, 4 * block_bytes + 2 * 1024 * 1024)
    if vmem_limit > vmem_budget:
        # Graceful large-B handling: raise toward physical capacity instead of
        # failing at compile time with the per-generation budget.
        # TODO(synk): for very large B, switch to a two-pass P3 layout
        # (accumulate a (TS,128) f32 scratch over B-chunks, then a cheap
        # broadcast kernel) so the per-block footprint stays independent of B.
        vmem_limit = min(vmem_limit, max(vmem_budget, vmem_cap - 8 * 1024 * 1024))

    out = pl.pallas_call(
        _reduce_copy_kernel,
        out_shape=jax.ShapeDtypeStruct((b, nseg, 128), x.dtype),
        grid=(grid_n,),
        in_specs=[pl.BlockSpec((b, ts, 128), lambda j: (0, j, 0))],
        out_specs=pl.BlockSpec((b, ts, 128), lambda j: (0, j, 0)),
        compiler_params=pltpu.CompilerParams(
            dimension_semantics=("parallel",),
            vmem_limit_bytes=int(vmem_limit),
        ),
    )(x3)

    out = out.reshape(b, f128)
    if f128 != f:
        out = out[:, :f]
    return out.reshape(orig_shape)


if __name__ == "__main__":
    key = jax.random.PRNGKey(0)
    x = jax.random.normal(key, (2, 4, 16, 16), dtype=jnp.float32)

    y = jax.block_until_ready(reduce_and_copy(x))

    # Reference check (pure JAX): mean over batch, tiled back to batch size.
    ref = jnp.broadcast_to(jnp.mean(x, axis=0, keepdims=True), x.shape)
    assert y.shape == x.shape and y.dtype == x.dtype
    assert jnp.allclose(y, ref, atol=1e-5, rtol=1e-5)

    print("KERNEL_OK")
</pallas_src>

<mosaic_0001>
module attributes {stable_mosaic.version = 11 : i64} {
  func.func @_reduce_copy_kernel(%arg0: i32, %arg1: memref<2x8x128xf32, #tpu.memory_space<vmem>>, %arg2: memref<2x8x128xf32, #tpu.memory_space<vmem>>) attributes {dimension_semantics = [#tpu.dimension_semantics<parallel>], iteration_bounds = array<i64: 1>, scalar_prefetch = 0 : i64, scratch_operands = 0 : i64, tpu.core_type = #tpu.core_type<tc>, window_params = [{transform_indices = @transform_0, window_bounds = array<i64: 2, 8, 128>}, {transform_indices = @transform_1, window_bounds = array<i64: 2, 8, 128>}]} {
    %c0 = arith.constant 0 : index
    %c0_0 = arith.constant 0 : index
    %c0_1 = arith.constant 0 : index
    %0 = vector.load %arg1[%c0, %c0_0, %c0_1] : memref<2x8x128xf32, #tpu.memory_space<vmem>>, vector<2x8x128xf32>
    %cst = arith.constant dense<0.000000e+00> : vector<8x128xf32>
    %1 = vector.multi_reduction <add>, %0, %cst [0] : vector<2x8x128xf32> to vector<8x128xf32>
    %2 = vector.shape_cast %1 : vector<8x128xf32> to vector<1x8x128xf32>
    %cst_2 = arith.constant 5.000000e-01 : f32
    %3 = vector.broadcast %cst_2 : f32 to vector<1x8x128xf32>
    %4 = arith.mulf %2, %3 : vector<1x8x128xf32>
    %5 = vector.shape_cast %4 : vector<1x8x128xf32> to vector<1x8x128xf32>
    %6 = vector.broadcast %5 : vector<1x8x128xf32> to vector<2x8x128xf32>
    %c0_3 = arith.constant 0 : index
    %c0_4 = arith.constant 0 : index
    %c0_5 = arith.constant 0 : index
    %7 = vector.load %arg2[%c0_3, %c0_4, %c0_5] : memref<2x8x128xf32, #tpu.memory_space<vmem>>, vector<2x8x128xf32>
    tpu.vector_store %arg2[%c0_3, %c0_4, %c0_5], %6 {strides = array<i32>} : memref<2x8x128xf32, #tpu.memory_space<vmem>>, vector<2x8x128xf32>,
    return
  }
  func.func @transform_0(%arg0: i32) -> (i32, i32, i32) {
    %c0_i32 = arith.constant 0 : i32
    %c0_i32_0 = arith.constant 0 : i32
    %c0_i32_1 = arith.constant 0 : i32
    return %c0_i32, %arg0, %c0_i32_0 : i32, i32, i32
  }
  func.func @transform_1(%arg0: i32) -> (i32, i32, i32) {
    %c0_i32 = arith.constant 0 : i32
    %c0_i32_0 = arith.constant 0 : i32
    %c0_i32_1 = arith.constant 0 : i32
    return %c0_i32, %arg0, %c0_i32_0 : i32, i32, i32
  }
}

</mosaic_0001>

<bundles_post_ra>
// kernel: tpu_custom_call.1
= control target key start
LH: loop header
LB: loop body
LE: loop exit
PB: predicated region body
PF: predicated region fallthrough
CT: control target
= control target key end

     0   :  { %6 = vsyncpa [#allocation3], 0  ;;  %s136_s0 = inlined_call_operand.hbm [shape: f32[2,8,128], index: 0, kind: input, shape index: {}]   ;;  %s137_s1 = inlined_call_operand.hbm [shape: f32[2,8,128], index: 1, kind: output, shape index: {}]  }
   0x1   :  { %7 = vsyncpa [#allocation4], 0  ;;  %s98_s6 = smov [#allocation2]   ;;  %s50_s10 = scalar_lea.hbm %s136_s0, 256 }
   0x2   :  { %s13_s7 = sshll.u32 %s98_s6, 4  ;;  %p51_p0 = scmp.ne.s32.totalorder %s136_s0, %s50_s10  ;;  %s14_s7 = int_to_ptr.vmem [resolvable:$true] %s13_s7 }
   0x3   :  { %p54_p1 = scmp.lt.u32.totalorder %s50_s10, %s136_s0 }
   0x5   :  { %p56_p2 = pnand %p54_p1, %p51_p0 }
   0x7   :  { %59 = shalt.err (!%p56_p2)
}
   0x8   :  { %s60_s15 = scalar_lea.vmem %s14_s7, 256  ;;  %p65_p4 = scmp.lt.s32.totalorder %s14_s7, %s14_s7 }
   0x9   :  { %p61_p3 = scmp.ne.s32.totalorder %s14_s7, %s60_s15  ;;  %p66_p5 = scmp.lt.s32.totalorder %s60_s15, %s60_s15 }
   0xb   :  { %p67_p6 = por %p66_p5, %p65_p4 }
   0xd   :  { %p68_p7 = pnand %p67_p6, %p61_p3 }
   0xf   :  { %71 = shalt.err (!%p68_p7)
}
  0x10   :  { %s99_s16 = smov 128   ;;  %s100_s17 = smov 8  }
  0x11   :  { %19 = dma.hbm_to_vmem [thread:$0]  %s136_s0, 256, %s14_s7, [#allocation3], %s99_s16, %s99_s16, %s100_s17  }
  0x12   :  { %94 = dma.done.wait [#allocation3], 256  }
  0x13   :  { %95 = vsyncadd [#allocation3], 4294967040  ;;  %v23_v0 = vld [vmem:[#allocation2] sm:$0xff]  ;;  %v24_v1 = vld [vmem:[#allocation2 + $0x8] sm:$0xff]  ;;  %s101_s20 = smov [#allocation5]  }
  0x14   :  { %s34_s21 = sshll.u32 %s101_s20, 4  ;;  %v25_v2 = vadd.f32 %v24_v1, %v23_v0  ;;  %s35_s21 = int_to_ptr.vmem [resolvable:$true] %s34_s21 }
  0x15   :  { %s72_s22 = scalar_lea.vmem %s35_s21, 256  ;;  %p77_p9 = scmp.lt.s32.totalorder %s35_s21, %s35_s21 }
  0x16   :  { %v26_v3 = vmul.f32 0.5, %v25_v2  ;;  %p73_p8 = scmp.ne.s32.totalorder %s35_s21, %s72_s22  ;;  %p78_p10 = scmp.lt.s32.totalorder %s72_s22, %s72_s22 }
  0x18   :  { %27 = vst [vmem:[#allocation5] sm:$0xff] %v26_v3  ;;  %28 = vst [vmem:[#allocation5 + $0x8] sm:$0xff] %v26_v3  ;;  %p79_p11 = por %p78_p10, %p77_p9 }
  0x1a   :  { %p80_p12 = pnand %p79_p11, %p73_p8 }
  0x1c   :  { %83 = shalt.err (!%p80_p12)
}
  0x1d   :  { %s84_s24 = scalar_lea.hbm %s137_s1, 256 }
  0x1e   :  { %p85_p13 = scmp.ne.s32.totalorder %s137_s1, %s84_s24  ;;  %p88_p0 = scmp.lt.u32.totalorder %s84_s24, %s137_s1 }
  0x20   :  { %p90_p1 = pnand %p88_p0, %p85_p13 }
  0x22   :  { %93 = shalt.err (!%p90_p1)
}
  0x23   :  { %40 = dma.vmem_to_hbm [thread:$0]  %s35_s21, 256, %s137_s1, [#allocation4], %s99_s16, %s99_s16, %s100_s17  }
  0x24   :  { %96 = dma.done.wait [#allocation4], 256  }
  0x25   :  { %97 = vsyncadd [#allocation4], 4294967040 }
  0x26   :  { %44 = vsyncpa [#allocation3], 1 }
  0x27   :  { %45 = vsyncpa [#allocation4], 1 }

</bundles_post_ra>
